<compile_context>
chip_gen: v7x
topology: tpu7x:2x2x1
jax: 0.10.0
libtpu: 0.0.40
codegen_flags: <defaults>
</compile_context>

<pallas_src>
import functools

import numpy as np
import jax
import jax.numpy as jnp
from jax import lax
from jax.experimental import pallas as pl
from jax.experimental.pallas import tpu as pltpu


# ----------------------------- Pallas hot path -----------------------------

def _torgb_kernel_noskip(x_ref, w_ref, b_ref, o_ref):
    # x_ref: (1, Cin, T), w_ref: (Cout, Cin), b_ref: (Cout, 1) f32, o_ref: (1, Cout, T)
    acc = jnp.dot(w_ref[...], x_ref[0], preferred_element_type=jnp.float32)
    o_ref[0] = (acc + b_ref[...]).astype(o_ref.dtype)


def _torgb_kernel_skip(x_ref, w_ref, b_ref, s_ref, o_ref):
    acc = jnp.dot(w_ref[...], x_ref[0], preferred_element_type=jnp.float32)
    acc = acc + b_ref[...] + s_ref[0].astype(jnp.float32)   # f32 bias/skip add
    o_ref[0] = acc.astype(o_ref.dtype)


_FALLBACK_VMEM_CAP = 64 * 1024 * 1024   # conservative fallback = v7x physical VMEM
_MAX_TILE_PIXELS = 64 * 1024            # absolute cap on pixels per tile


def _vmem_capacity_bytes():
    """Physical VMEM of the current TPU generation (trace-time query)."""
    try:
        cap = int(getattr(pltpu.get_tpu_info(), "vmem_capacity_bytes"))
        if cap > 0:
            return cap
    except Exception:
        pass
    return _FALLBACK_VMEM_CAP


def _pick_tile(hw, bytes_per_pixel, vmem_cap, max_tile=None):
    """Largest legal pixel tile under a VMEM budget.

    The double-buffered working set per grid step is bytes_per_pixel * tile; keep
    it under ~45% of the physical VMEM so blocks + compiler scratch fit with
    headroom on v5e/v6e (128 MiB) and v7x (64 MiB).  Full row if it fits, else a
    multiple-of-128 divisor of hw (GAN spatial sizes are powers of two, so this
    always hits)."""
    budget = int(vmem_cap * 0.45)
    cap = budget // max(bytes_per_pixel, 1)
    cap = min(cap, _MAX_TILE_PIXELS if max_tile is None else max_tile)
    cap = max((cap // 128) * 128, 128)
    if hw <= cap:
        return hw
    for cand in range(cap, 127, -128):
        if hw % cand == 0:
            return cand
    return hw  # fallback: full-extent block (always a legal BlockSpec)


def _torgb_conv(x3, w2, b2, s3=None, *, max_tile=None):
    """x3: (N, Cin, HW), w2: (Cout, Cin), b2: (Cout, 1) f32,
    s3: (N, Cout, HW) (same dtype as x3) or None."""
    n, cin, hw = x3.shape
    cout = w2.shape[0]
    elem = jnp.dtype(x3.dtype).itemsize

    # Double-buffered per-pixel working set: x block + out block (+ skip block).
    bytes_per_pixel = 2 * elem * (cin + cout + (cout if s3 is not None else 0))
    vmem_cap = _vmem_capacity_bytes()
    tile = _pick_tile(hw, bytes_per_pixel, vmem_cap, max_tile)

    # v7x has 2 TensorCores: make sure the fully-"parallel" grid has >= 2 steps
    # when possible so neither core idles and DMA prologue/epilogue can overlap.
    if n * (hw // tile) < 2 and tile % 256 == 0:
        tile //= 2

    grid = (n, hw // tile)

    x_spec = pl.BlockSpec((1, cin, tile), lambda b, j: (b, 0, j))
    w_spec = pl.BlockSpec((cout, cin), lambda b, j: (0, 0))    # resident
    b_spec = pl.BlockSpec((cout, 1), lambda b, j: (0, 0))      # resident
    o_spec = pl.BlockSpec((1, cout, tile), lambda b, j: (b, 0, j))

    io_aliases = {}
    if s3 is None:
        kernel = _torgb_kernel_noskip
        in_specs = [x_spec, w_spec, b_spec]
        args = (x3, w2, b2)
    else:
        kernel = _torgb_kernel_skip
        s_spec = pl.BlockSpec((1, cout, tile), lambda b, j: (b, 0, j))
        in_specs = [x_spec, w_spec, b_spec, s_spec]
        args = (x3, w2, b2, s3)
        # The skip input and the output have identical shape/dtype/index map:
        # alias them so XLA reuses the skip intermediate's buffer for the output
        # (one fewer full-resolution HBM allocation on the skip path).
        io_aliases = {3: 0}

    n_stream = cin + cout + (cout if s3 is not None else 0)
    cost = pl.CostEstimate(
        flops=2 * cout * cin * n * hw,
        transcendentals=0,
        bytes_accessed=n_stream * n * hw * elem + (cout * cin + cout) * 4,
    )

    return pl.pallas_call(
        kernel,
        out_shape=jax.ShapeDtypeStruct((n, cout, hw), x3.dtype),
        grid_spec=pltpu.PrefetchScalarGridSpec(
            num_scalar_prefetch=0,
            grid=grid,
            in_specs=in_specs,
            out_specs=o_spec,
        ),
        input_output_aliases=io_aliases,
        cost_estimate=cost,
        compiler_params=pltpu.CompilerParams(
            dimension_semantics=("parallel", "parallel"),
            vmem_limit_bytes=int(vmem_cap * 0.7),   # raise v5e's 16 MiB default; headroom on v7x
        ),
    )(*args)


# ------------------- wavelet / upfirdn2d reference chain -------------------
# Host-side numpy (float64) implementation of the exact torch semantics of
# InverseHaarTransform -> Upsample(blur) -> HaarTransform.  Used (a) once to
# derive the fused composite conv weight as a concrete f32 constant, and (b) as
# the ground-truth reference in the self-test.

def _np_make_blur_kernel(k):
    k = np.asarray(k, np.float64)
    if k.ndim == 1:
        k = np.outer(k, k)
    return k / k.sum()


def _np_upfirdn2d(x, kernel, up=1, down=1, pad=(0, 0)):
    """StyleGAN2 upfirdn2d_native semantics. x: (N,C,H,W) float64, kernel (kh,kw)."""
    if len(pad) == 2:
        pad = (pad[0], pad[1], pad[0], pad[1])
    px0, px1, py0, py1 = pad
    assert min(pad) >= 0
    n, c, h, w = x.shape
    kh, kw = kernel.shape
    # zero-insertion upsample: each sample followed by (up-1) zeros.
    y = np.zeros((n, c, h * up, w * up), np.float64)
    y[:, :, ::up, ::up] = x
    y = np.pad(y, ((0, 0), (0, 0), (py0, py1), (px0, px1)))
    # torch reference flips the kernel then cross-correlates.
    kk = kernel[::-1, ::-1]
    oh = y.shape[2] - kh + 1
    ow = y.shape[3] - kw + 1
    out = np.zeros((n, c, oh, ow), np.float64)
    for dy in range(kh):
        for dx in range(kw):
            out += kk[dy, dx] * y[:, :, dy:dy + oh, dx:dx + ow]
    return out[:, :, ::down, ::down]


def _np_haar_filters():
    l = np.full((1, 2), 1.0 / np.sqrt(2.0))
    h = np.array([[-1.0, 1.0]]) / np.sqrt(2.0)
    return l.T * l, h.T * l, l.T * h, h.T * h   # ll, lh, hl, hh


def _np_haar_transform(x):
    ll, lh, hl, hh = _np_haar_filters()
    return np.concatenate([_np_upfirdn2d(x, k, down=2) for k in (ll, lh, hl, hh)],
                          axis=1)


def _np_inverse_haar_transform(x):
    ll, lh, hl, hh = _np_haar_filters()
    lh, hl = -lh, -hl
    parts = np.split(x, 4, axis=1)
    outs = [_np_upfirdn2d(p, k, up=2, pad=(1, 0, 1, 0))
            for p, k in zip(parts, (ll, lh, hl, hh))]
    return outs[0] + outs[1] + outs[2] + outs[3]


def _np_upsample_blur(x, blur_kernel=(1, 3, 3, 1), factor=2):
    k = _np_make_blur_kernel(blur_kernel) * (factor ** 2)
    p = k.shape[0] - factor
    pad0 = (p + 1) // 2 + factor - 1
    pad1 = p // 2
    return _np_upfirdn2d(x, k, up=factor, down=1, pad=(pad0, pad1))


def _np_skip_chain(skip):
    """Ground truth: IWT -> Upsample(blur) -> DWT, float64, (N,12,Hs,Ws)->(N,12,2Hs,2Ws)."""
    return _np_haar_transform(_np_upsample_blur(_np_inverse_haar_transform(skip)))


# --------------------- fused skip transform (single conv) -------------------
# The chain IWT -> Upsample(blur) -> DWT is a zero-padded, shift-covariant linear
# map (skip shift 1 <-> output shift 2) with composite support of only 4x4 taps
# per (out, in) channel pair.  Measure the interior impulse response once (host
# numpy, float64 -> concrete f32 constant; no jnp/tracer caching hazard) and
# realize the whole chain as one lhs_dilation=2 conv.

@functools.lru_cache(maxsize=1)
def fused_skip_weight():
    S = 8
    delta = np.zeros((12, 12, S, S), np.float64)
    delta[:, :, S // 2, S // 2] = np.eye(12)
    resp = _np_skip_chain(delta)                        # (in_ch, out_ch, 2S, 2S)
    c = 2 * (S // 2)
    # composite support is d = y - 2p in [-1, 2]  ->  4x4 patch around 2p
    patch = resp[:, :, c - 1:c + 3, c - 1:c + 3]        # (in_ch, out_ch, 4, 4)
    # conv with padding (2,2) & lhs_dilation=2:  W[o,i,ky,kx] = R[o,i, 2-ky, 2-kx]
    w = np.flip(np.transpose(patch, (1, 0, 2, 3)), (2, 3))  # OIHW (12,12,4,4)
    return np.ascontiguousarray(w, dtype=np.float32)


def fused_skip_transform(skip):
    """(N, 12, Hs, Ws) -> (N, 12, 2Hs, 2Ws), equal to IWT -> Upsample -> DWT.

    Runs at the hardware default conv precision (bf16 multiplies / f32 accumulate
    on TPU): the weights are a fixed blur/wavelet bank, and HIGHEST would force
    3-6x MXU emulation passes on v6e/v7x for no accuracy benefit.
    """
    # TODO(synk): fold this 12->12 up-conv into the Pallas kernel (per-output-phase
    # 2x2 taps over a haloed quarter-res skip tile, 2-D grid) to remove the
    # full-resolution skip round trip through HBM entirely.
    w = jnp.asarray(fused_skip_weight(), dtype=skip.dtype)
    return lax.conv_general_dilated(
        skip, w,
        window_strides=(1, 1),
        padding=((2, 2), (2, 2)),
        lhs_dilation=(2, 2),
        dimension_numbers=("NCHW", "OIHW", "NCHW"),
    )


# ------------------------------ module forward ------------------------------

@functools.partial(jax.jit, static_argnames=("max_tile",))
def to_rgb_wavelet(x, weight, bias, skip=None, *, max_tile=None):
    """ToRGB_wavelet.forward.  x: (N, Cin, H, W);  weight: (12, Cin);  bias: (12,);
    skip (optional): (N, 12, H//2, W//2).  Returns (N, 12, H, W) in NCHW."""
    n, cin, h, w = x.shape
    cout = weight.shape[0]
    hw = h * w

    x3 = x.reshape(n, cin, hw)                      # NCHW -> (N, Cin, HW), no transpose
    w2 = weight.astype(x.dtype)                     # (Cout, Cin)
    b2 = bias.reshape(cout, 1).astype(jnp.float32)  # f32 bias added to f32 accumulator

    s3 = None
    if skip is not None:
        s = fused_skip_transform(skip.astype(x.dtype))      # (N, 12, H, W)
        # s is a jit-local intermediate; input_output_aliases={3: 0} in the
        # pallas_call lets XLA reuse its buffer for the kernel output.
        s3 = s.astype(x.dtype).reshape(n, cout, hw)

    # TODO(synk): optional bf16 streaming of x/skip/out (f32 accumulate in-kernel)
    # would halve HBM traffic on this bandwidth-bound kernel if GAN numerics allow.
    out3 = _torgb_conv(x3, w2, b2, s3, max_tile=max_tile)
    return out3.reshape(n, cout, h, w)


# ----------------------------------- main -----------------------------------

if __name__ == "__main__":
    key = jax.random.PRNGKey(0)
    k_x, k_skip, k_w, k_b = jax.random.split(key, 4)

    N, Cin, H, W = 2, 16, 16, 16
    Cout = 3 * 4

    x = jax.random.normal(k_x, (N, Cin, H, W), jnp.float32)
    skip = jax.random.normal(k_skip, (N, Cout, H // 2, W // 2), jnp.float32)
    # Deterministic synthetic Conv2d(Cin, 12, 1) parameters.
    weight = jax.random.normal(k_w, (Cout, Cin), jnp.float32) * 0.1
    bias = jax.random.normal(k_b, (Cout,), jnp.float32) * 0.1

    # skip=None path and full path, both jitted end to end.
    out_no_skip = jax.block_until_ready(to_rgb_wavelet(x, weight, bias, None))
    out_skip = jax.block_until_ready(to_rgb_wavelet(x, weight, bias, skip))

    assert out_no_skip.shape == (N, Cout, H, W)
    assert out_skip.shape == (N, Cout, H, W)

    # Ground-truth references in float64 numpy.
    x_np = np.asarray(x, dtype=np.float64)
    w_np = np.asarray(weight, dtype=np.float64)
    b_np = np.asarray(bias, dtype=np.float64)
    conv_ref = np.einsum("nchw,oc->nohw", x_np, w_np) + b_np[None, :, None, None]
    skip_ref = _np_skip_chain(np.asarray(skip, dtype=np.float64))

    # 1) Pallas 1x1-conv path (tight, f32 accuracy).
    np.testing.assert_allclose(np.asarray(out_no_skip), conv_ref,
                               rtol=1e-5, atol=1e-5)

    # 2) Pallas skip-add path (tight): feed the exact f64 skip transform straight
    #    into the kernel, isolating it from the runtime conv precision.
    x3 = x.reshape(N, Cin, H * W)
    s3_exact = jnp.asarray(skip_ref, jnp.float32).reshape(N, Cout, H * W)
    out_direct = jax.block_until_ready(
        jax.jit(_torgb_conv)(x3, weight, bias.reshape(Cout, 1), s3_exact))
    np.testing.assert_allclose(np.asarray(out_direct).reshape(N, Cout, H, W),
                               conv_ref + skip_ref, rtol=1e-5, atol=1e-5)

    # 3) End-to-end skip path: fused 4x4 composite conv vs. the staged wavelet
    #    chain.  The runtime conv intentionally uses the hardware default matmul
    #    precision (bf16 multiplies on TPU), so the tolerance reflects bf16-level
    #    rounding; the fusion / boundary math itself is exact (checked in 2).
    np.testing.assert_allclose(np.asarray(out_skip), conv_ref + skip_ref,
                               rtol=5e-2, atol=5e-2)

    print("KERNEL_OK")
</pallas_src>

<mosaic_0001>
module attributes {stable_mosaic.version = 11 : i64} {
  func.func @_torgb_kernel_noskip(%arg0: i32, %arg1: i32, %arg2: memref<1x16x256xf32, #tpu.memory_space<vmem>>, %arg3: memref<12x16xf32, #tpu.memory_space<vmem>>, %arg4: memref<12x1xf32, #tpu.memory_space<vmem>>, %arg5: memref<1x12x256xf32, #tpu.memory_space<vmem>>) attributes {dimension_semantics = [#tpu.dimension_semantics<parallel>, #tpu.dimension_semantics<parallel>], iteration_bounds = array<i64: 2, 1>, scalar_prefetch = 0 : i64, scratch_operands = 0 : i64, tpu.core_type = #tpu.core_type<tc>, window_params = [{transform_indices = @transform_0, window_bounds = array<i64: 1, 16, 256>}, {pipeline_mode = #tpu.pipeline_mode<synchronous>, transform_indices = @transform_1, window_bounds = array<i64: 12, 16>}, {pipeline_mode = #tpu.pipeline_mode<synchronous>, transform_indices = @transform_2, window_bounds = array<i64: 12, 1>}, {transform_indices = @transform_3, window_bounds = array<i64: 1, 12, 256>}]} {
    %c0 = arith.constant 0 : index
    %c0_0 = arith.constant 0 : index
    %0 = vector.load %arg3[%c0, %c0_0] : memref<12x16xf32, #tpu.memory_space<vmem>>, vector<12x16xf32>
    %c0_1 = arith.constant 0 : index
    %c0_2 = arith.constant 0 : index
    %c0_3 = arith.constant 0 : index
    %1 = vector.load %arg2[%c0_1, %c0_2, %c0_3] : memref<1x16x256xf32, #tpu.memory_space<vmem>>, vector<1x16x256xf32>
    %2 = vector.shape_cast %1 : vector<1x16x256xf32> to vector<16x256xf32>
    %cst = arith.constant dense<0.000000e+00> : vector<12x256xf32>
    %3 = tpu.matmul %0, %2, %cst {dimension_numbers = #tpu.dot_dimension_numbers<[1], [0], [0], [1], [0, 0, 1, 1], [], []>} : vector<12x16xf32>, vector<16x256xf32>, vector<12x256xf32> -> vector<12x256xf32>
    %c0_4 = arith.constant 0 : index
    %c0_5 = arith.constant 0 : index
    %4 = vector.load %arg4[%c0_4, %c0_5] : memref<12x1xf32, #tpu.memory_space<vmem>>, vector<12x1xf32>
    %5 = vector.broadcast %4 : vector<12x1xf32> to vector<12x256xf32>
    %6 = arith.addf %3, %5 : vector<12x256xf32>
    %c0_6 = arith.constant 0 : index
    %c0_7 = arith.constant 0 : index
    %c0_8 = arith.constant 0 : index
    %7 = vector.load %arg5[%c0_6, %c0_7, %c0_8] : memref<1x12x256xf32, #tpu.memory_space<vmem>>, vector<1x12x256xf32>
    %8 = vector.shape_cast %7 : vector<1x12x256xf32> to vector<12x256xf32>
    %9 = vector.shape_cast %6 : vector<12x256xf32> to vector<1x12x256xf32>
    tpu.vector_store %arg5[%c0_6, %c0_7, %c0_8], %9 {strides = array<i32>} : memref<1x12x256xf32, #tpu.memory_space<vmem>>, vector<1x12x256xf32>,
    return
  }
  func.func @transform_0(%arg0: i32, %arg1: i32) -> (i32, i32, i32) {
    %c0_i32 = arith.constant 0 : i32
    %c0_i32_0 = arith.constant 0 : i32
    return %arg0, %c0_i32, %arg1 : i32, i32, i32
  }
  func.func @transform_1(%arg0: i32, %arg1: i32) -> (i32, i32) {
    %c0_i32 = arith.constant 0 : i32
    %c0_i32_0 = arith.constant 0 : i32
    %c0_i32_1 = arith.constant 0 : i32
    return %c0_i32, %c0_i32_0 : i32, i32
  }
  func.func @transform_2(%arg0: i32, %arg1: i32) -> (i32, i32) {
    %c0_i32 = arith.constant 0 : i32
    %c0_i32_0 = arith.constant 0 : i32
    %c0_i32_1 = arith.constant 0 : i32
    return %c0_i32, %c0_i32_0 : i32, i32
  }
  func.func @transform_3(%arg0: i32, %arg1: i32) -> (i32, i32, i32) {
    %c0_i32 = arith.constant 0 : i32
    %c0_i32_0 = arith.constant 0 : i32
    return %arg0, %c0_i32, %arg1 : i32, i32, i32
  }
}

</mosaic_0001>

<bundles_post_ra>
// kernel: to_rgb_wavelet.1
= control target key start
LH: loop header
LB: loop body
LE: loop exit
PB: predicated region body
PF: predicated region fallthrough
CT: control target
= control target key end

     0   :  { %s497_s12 = smov 0   ;;  %s499_s13 = smov 0   ;;  %s542_s0 = inlined_call_operand.vmem [shape: f32[2,16,256], index: 0, kind: input, shape index: {}]   ;;  %s543_s1 = inlined_call_operand.vmem [shape: f32[12,16], index: 1, kind: input, shape index: {}]   ;;  %s544_s2 = inlined_call_operand.vmem [shape: f32[12,1], index: 2, kind: input, shape index: {}]   ;;  %s545_s3 = inlined_call_operand.vmem [shape: f32[2,12,256], index: 3, kind: output, shape index: {}]  }
   0x1   :  { %s501_s14 = smov 0  }
   0x2 LB: > { %s25_s15 = sadd.s32 1, %s469_s13  ;;  %p407_p0 = scmp.ge.s32.totalorder %s473_s14, 1  ;;  %s473_s14 = sphi %s501_s14, %s13_s14   ;;  %s469_s13 = sphi %s499_s13, %s547_s13   ;;  %s465_s12 = sphi %s497_s12, %s546_s12  }
   0x3   : > { %p27_p1 = scmp.ge.s32.totalorder %s25_s15, 2  ;;  %p158_p2 = scmp.lt.s32.totalorder %s473_s14, 3 }
   0x5   : > { %s549_s15 = smov (%p27_p1, %s25_s15), 0  ;;  %p159_p3 = pnand %p407_p0, %p158_p2 }
   0x6   : > { %p191_p4 = scmp.lt.s32.totalorder (!%p159_p3), %s465_s12, 1  ;;  %v475_v0 = vmov (!%p159_p3), 0.0   ;;  %v216_v1 = vld [vmem:[%s544_s2] sm:$0xff] (!%p159_p3)  ;;  %v476_v2 = vmov (!%p159_p3), 0   ;;  %v217_v3 = vld [vmem:[%s544_s2 + $0x8] sm:$0xf] (!%p159_p3) }
   0x7   : > { %162 = sbr.rel (%p159_p3) target bundleno = 240 (0xf0), region = 32  ;;  %299 = vmatprep.mubr.f32.mxu0 (!%p159_p3), %v475_v0  ;;  %305 = vmatprep.mubr.f32.mxu1 (!%p159_p3), %v475_v0  ;;  %v210_v10 = vld [vmem:[%s543_s1] sm:$0xff] (!%p159_p3)  ;;  %vm228_vm0 = vcmask (!%p159_p3), 130048   ;;  %v211_v11 = vld [vmem:[%s543_s1 + $0x8] sm:$0xf] (!%p159_p3) }
   0x8   : > { %450 = vset.pattern.permute.xlu0 (!%p159_p3), %v476_v2 }
   0x9   : > { %220 = vperm.xlu0 (!%p159_p3), %450, %v216_v1  }
   0xd   : > { %225 = vperm.xlu0 (!%p159_p3), %450, %v217_v3  }
   0xe   : > { %s551_s12 = smov (!%p191_p4, %s465_s12), 1 }
   0xf   : > { %s416_s18 = sshll.u32 %s551_s12, 5 }
  0x10   : > { %s198_s23 = scalar_lea.vmem %s542_s0, %s416_s18  ;;  %s208_s30 = scalar_lea.vmem %s545_s3, %s416_s18 }
  0x11   : > { %v213_v4 = vld [vmem:[%s198_s23 + $0x8] sm:$0xff]  ;;  %v215_v5 = vld [vmem:[%s198_s23 + $0x18] sm:$0xff]  ;;  %v212_v6 = vld [vmem:[%s198_s23] sm:$0xff] }
  0x12   : > { %v418_v7 = vpack.c.bf16 %v215_v5, %v213_v4  ;;  %v214_v8 = vld [vmem:[%s198_s23 + $0x10] sm:$0xff] }
  0x13   : > { %v420_v9 = vpack.c.bf16 %v214_v8, %v212_v6 }
  0x14   : > { %419 = vmatprep.subr.bf16.mxu0 %v418_v7  ;;  %422 = vmatprep.subr.bf16.mxu1 %v418_v7 }
  0x15   : > { %421 = vmatpush1.bf16.msra.mxu0 %v420_v9  ;;  %423 = vmatpush1.bf16.msra.mxu1 %v420_v9 }
  0x18   : > { %412 = vmatmul.mubr.msk.f32.vlgmr.msra.gmra.mrb[0].mxu0 %vm228_vm0, %v210_v10  ;;  %413 = vmatmul.mubr.msk.f32.vlgmr.msra.gmra.mrb[0].mxu1 %vm228_vm0, %v211_v11 }
  0x88   : > { %v221_v12 = vpop.permute.xlu0 %220 }
  0x8c   : > { %v226_v13 = vpop.permute.xlu0 %225 }
  0xeb   : > { %v301_v14 = vpop.f32.mrb[0].mxu0  ;;  %v307_v15 = vpop.f32.mrb[0].mxu1 }
  0xec   : > { %v302_v16 = vadd.f32 %v301_v14, %v221_v12  ;;  %v308_v17 = vadd.f32 %v307_v15, %v226_v13  ;;  %v303_v18 = vpop.f32.mrb[1].mxu0  ;;  %v309_v19 = vpop.f32.mrb[1].mxu1 }
  0xed   : > { %v304_v20 = vadd.f32 %v303_v18, %v221_v12  ;;  %v310_v21 = vadd.f32 %v309_v19, %v226_v13 }
  0xee   : > { %312 = vst [vmem:[%s208_s30] sm:$0xff] %v302_v16  ;;  %314 = vst [vmem:[%s208_s30 + $0x10] sm:$0xf] %v308_v17 }
  0xef   : > { %313 = vst [vmem:[%s208_s30 + $0x8] sm:$0xff] %v304_v20  ;;  %315 = vst [vmem:[%s208_s30 + $0x18] sm:$0xf] %v310_v21 }
  0xf0 PF: > { %s13_s14 = sadd.s32 1, %s473_s14   ;;  %s546_s12 = smov %s469_s13 }
  0xf1   : > { %p10_p5 = scmp.ge.s32.totalorder %s13_s14, 4   ;;  %s547_s13 = smov %s549_s15 }
  0xf3   :  { %12 = sbr.rel (!%p10_p5) target bundleno = 2 (0x2), region = 62 }

</bundles_post_ra>
